<compile_context>
chip_gen: v5e
topology: v5e:2x2
jax: 0.10.0
libtpu: 0.0.40
codegen_flags: <defaults>
</compile_context>

<pallas_src>
import functools

import jax
import jax.numpy as jnp
from jax import lax
from jax.experimental import pallas as pl
from jax.experimental.pallas import tpu as pltpu

_MIB = 1024 * 1024
_LANE = 128
_TARGET_BLOCK_BYTES = 2 * _MIB    # per x-block; out adds the same again
_MIN_BLOCK_BYTES = 512 * 1024     # don't fragment below the roofline knee
_MIN_STEPS = 8                    # >=8 & even: hides ramp/drain, feeds both v7x TCs


def _round_up(a, b):
    return ((a + b - 1) // b) * b


def _choose_blocks(rows, lanes, sub, elem_bytes):
    """Pick (row_block, lane_block) for a (rows, lanes) streaming elementwise op."""
    row_bytes = lanes * elem_bytes

    # Largest row block (multiple of `sub`, or all rows) within the byte target
    # at full lane extent.
    if rows <= sub:
        rb = rows
    else:
        fit = (_TARGET_BLOCK_BYTES // max(row_bytes, 1)) // sub * sub
        rb = max(sub, min(fit, (rows // sub) * sub))
    grid_r = pl.cdiv(rows, rb)
    block_bytes = rb * row_bytes

    # Split the lane dimension when the row grid is short (no pipelining, one
    # idle v7x core) or a single full-lane slab is oversized.
    need_lane_split = lanes > _LANE and (
        grid_r < _MIN_STEPS or block_bytes > 2 * _TARGET_BLOCK_BYTES)
    if not need_lane_split:
        return rb, lanes

    per_lane_bytes = rb * elem_bytes
    cl_target = max(_LANE,
                    (_TARGET_BLOCK_BYTES // per_lane_bytes) // _LANE * _LANE)
    want_lane_steps = pl.cdiv(_MIN_STEPS, grid_r)
    cl_steps = _round_up(pl.cdiv(lanes, want_lane_steps), _LANE)
    cl = min(cl_target, cl_steps)
    # Never shrink below _MIN_BLOCK_BYTES just to manufacture steps.
    cl_min = _round_up(pl.cdiv(_MIN_BLOCK_BYTES, per_lane_bytes), _LANE)
    cl = max(cl, min(cl_min, _round_up(lanes, _LANE)), _LANE)
    if cl >= lanes:
        return rb, lanes
    return rb, cl


def _frozen_bn_kernel(par_ref, x_ref, o_ref, *, params_per_row):
    """y = x * scale + shift, scale/shift broadcast per row (layout A) or lane (B)."""
    par = par_ref[...]                                  # f32 packed params
    if params_per_row:
        scale, shift = par[:, 0:1], par[:, 1:2]         # (rb, 1) each
    else:
        scale, shift = par[0:1, :], par[1:2, :]         # (1, cl) each
    x = x_ref[...].astype(jnp.float32)                  # f32 compute (safe on v5e)
    o_ref[...] = (x * scale + shift).astype(o_ref.dtype)


def frozen_batchnorm2d(x, weight, bias, running_mean, running_var,
                       eps: float = 1e-5, *, donate_x: bool = False,
                       vmem_limit_bytes=None):
    """Frozen batch-norm forward: y = x * (w * rsqrt(rv+eps)) + (b - rm*scale).

    x: (N, C, H, W); weight/bias/running_mean/running_var: (C,).
    """
    N, C, H, W = x.shape
    L = H * W
    out_dtype = x.dtype
    elem = jnp.dtype(x.dtype).itemsize
    sub = {4: 8, 2: 16, 1: 32}.get(elem, 8)   # sublane multiple for the dtype

    # --- Fold the frozen affine once (params never change at inference).
    w = weight.astype(jnp.float32)
    b = bias.astype(jnp.float32)
    rm = running_mean.astype(jnp.float32)
    rv = running_var.astype(jnp.float32)
    scale_c = w * lax.rsqrt(rv + jnp.float32(eps))
    shift_c = b - rm * scale_c

    # --- Lane-dense layout selection.
    params_per_row = not (L % _LANE != 0 and L < 1024)
    if params_per_row:
        # Layout A: one (batch, channel) plane per row; params are per-row.
        rows, lanes = N * C, L
        x2 = x.reshape(rows, lanes)
        par = jnp.stack(
            [jnp.broadcast_to(scale_c[None, :], (N, C)).reshape(rows),
             jnp.broadcast_to(shift_c[None, :], (N, C)).reshape(rows)],
            axis=-1)                                    # (rows, 2) f32
    else:
        # Layout B: one sample per row; params are a per-lane vector.
        rows, lanes = N, C * L
        x2 = x.reshape(rows, lanes)
        par = jnp.stack(
            [jnp.broadcast_to(scale_c[:, None], (C, L)).reshape(lanes),
             jnp.broadcast_to(shift_c[:, None], (C, L)).reshape(lanes)],
            axis=0)                                     # (2, lanes) f32

    rb, cl = _choose_blocks(rows, lanes, sub, elem)
    grid = (pl.cdiv(rows, rb), pl.cdiv(lanes, cl))

    x_spec = pl.BlockSpec((rb, cl), lambda i, j: (i, j))
    if params_per_row:
        par_spec = pl.BlockSpec((rb, 2), lambda i, j: (i, 0))   # invariant in j
    else:
        par_spec = pl.BlockSpec((2, cl), lambda i, j: (0, j))   # invariant in i

    if vmem_limit_bytes is None:
        # Blocks are capped at ~2 MiB, so a 32 MiB scoped limit is generous on
        # every generation (v5e/v6e: 128 MiB physical, v7x: 64 MiB physical).
        vmem_limit_bytes = 32 * _MIB

    out2 = pl.pallas_call(
        functools.partial(_frozen_bn_kernel, params_per_row=params_per_row),
        out_shape=jax.ShapeDtypeStruct((rows, lanes), out_dtype),
        grid_spec=pltpu.PrefetchScalarGridSpec(
            num_scalar_prefetch=0,
            grid=grid,
            in_specs=[par_spec, x_spec],
            out_specs=x_spec,
        ),
        compiler_params=pltpu.CompilerParams(
            dimension_semantics=("parallel", "parallel"),
            vmem_limit_bytes=vmem_limit_bytes,
        ),
        input_output_aliases=({1: 0} if donate_x else {}),
    )(par, x2)

    return out2.reshape(N, C, H, W)


def _reference(x, weight, bias, running_mean, running_var, eps=1e-5):
    w = weight.reshape(1, -1, 1, 1)
    b = bias.reshape(1, -1, 1, 1)
    rv = running_var.reshape(1, -1, 1, 1)
    rm = running_mean.reshape(1, -1, 1, 1)
    scale = w * lax.rsqrt(rv + eps)
    bias_ = b - rm * scale
    return x * scale + bias_


def _make_inputs(key, N, C, H, W, dtype=jnp.float32):
    kx, kw, kb, km, kv = jax.random.split(key, 5)
    x = jax.random.normal(kx, (N, C, H, W), dtype=dtype)
    weight = jnp.ones((C,), jnp.float32) + 0.1 * jax.random.normal(kw, (C,))
    bias = jnp.zeros((C,), jnp.float32) + 0.1 * jax.random.normal(kb, (C,))
    running_mean = jnp.zeros((C,), jnp.float32) + 0.1 * jax.random.normal(km, (C,))
    running_var = jnp.ones((C,), jnp.float32) + 0.1 * jnp.abs(
        jax.random.normal(kv, (C,)))
    return x, weight, bias, running_mean, running_var


if __name__ == "__main__":
    key = jax.random.PRNGKey(0)

    # Main small shape, plus shapes exercising: layout B (7x7 spatial),
    # ragged row blocks, and a 2-D (row x lane) grid with param reuse.
    shapes = [
        (2, 4, 16, 16),    # layout A, single block
        (2, 8, 7, 7),      # layout B (lane-dense for small spatial)
        (2, 5, 128, 128),  # layout A, ragged final row block
        (2, 16, 128, 128), # layout A, lane-split 2-D grid
    ]
    for idx, (N, C, H, W) in enumerate(shapes):
        key, sub_key = jax.random.split(key)
        x, weight, bias, running_mean, running_var = _make_inputs(
            sub_key, N, C, H, W)
        out = frozen_batchnorm2d(x, weight, bias, running_mean, running_var)
        out = jax.block_until_ready(out)
        ref = _reference(x, weight, bias, running_mean, running_var)
        assert out.shape == (N, C, H, W)
        assert jnp.allclose(out, ref, atol=1e-5, rtol=1e-5), \
            f"mismatch vs reference for shape {(N, C, H, W)}"

    print("KERNEL_OK")
</pallas_src>

<mosaic_0001>
module attributes {stable_mosaic.version = 11 : i64} {
  func.func @_frozen_bn_kernel(%arg0: i32, %arg1: i32, %arg2: memref<8x2xf32, #tpu.memory_space<vmem>>, %arg3: memref<8x256xf32, #tpu.memory_space<vmem>>, %arg4: memref<8x256xf32, #tpu.memory_space<vmem>>) attributes {dimension_semantics = [#tpu.dimension_semantics<parallel>, #tpu.dimension_semantics<parallel>], iteration_bounds = array<i64: 1, 1>, scalar_prefetch = 0 : i64, scratch_operands = 0 : i64, tpu.core_type = #tpu.core_type<tc>, window_params = [{transform_indices = @transform_0, window_bounds = array<i64: 8, 2>}, {transform_indices = @transform_1, window_bounds = array<i64: 8, 256>}, {transform_indices = @transform_2, window_bounds = array<i64: 8, 256>}]} {
    %c0 = arith.constant 0 : index
    %c0_0 = arith.constant 0 : index
    %0 = vector.load %arg2[%c0, %c0_0] : memref<8x2xf32, #tpu.memory_space<vmem>>, vector<8x2xf32>
    %1 = vector.extract_strided_slice %0 {offsets = [0, 0], sizes = [8, 1], strides = [1, 1]} : vector<8x2xf32> to vector<8x1xf32>
    %2 = vector.extract_strided_slice %0 {offsets = [0, 1], sizes = [8, 1], strides = [1, 1]} : vector<8x2xf32> to vector<8x1xf32>
    %c0_1 = arith.constant 0 : index
    %c0_2 = arith.constant 0 : index
    %3 = vector.load %arg3[%c0_1, %c0_2] : memref<8x256xf32, #tpu.memory_space<vmem>>, vector<8x256xf32>
    %4 = vector.broadcast %1 : vector<8x1xf32> to vector<8x256xf32>
    %5 = arith.mulf %3, %4 : vector<8x256xf32>
    %6 = vector.broadcast %2 : vector<8x1xf32> to vector<8x256xf32>
    %7 = arith.addf %5, %6 : vector<8x256xf32>
    %c0_3 = arith.constant 0 : index
    %c0_4 = arith.constant 0 : index
    %8 = vector.load %arg4[%c0_3, %c0_4] : memref<8x256xf32, #tpu.memory_space<vmem>>, vector<8x256xf32>
    tpu.vector_store %arg4[%c0_3, %c0_4], %7 {strides = array<i32>} : memref<8x256xf32, #tpu.memory_space<vmem>>, vector<8x256xf32>,
    return
  }
  func.func @transform_0(%arg0: i32, %arg1: i32) -> (i32, i32) {
    %c0_i32 = arith.constant 0 : i32
    %c0_i32_0 = arith.constant 0 : i32
    return %arg0, %c0_i32 : i32, i32
  }
  func.func @transform_1(%arg0: i32, %arg1: i32) -> (i32, i32) {
    %c0_i32 = arith.constant 0 : i32
    return %arg0, %arg1 : i32, i32
  }
  func.func @transform_2(%arg0: i32, %arg1: i32) -> (i32, i32) {
    %c0_i32 = arith.constant 0 : i32
    return %arg0, %arg1 : i32, i32
  }
}

</mosaic_0001>

<bundles_post_ra>
// kernel: tpu_custom_call.1
= control target key start
LH: loop header
LB: loop body
LE: loop exit
PB: predicated region body
PF: predicated region fallthrough
CT: control target
= control target key end

     0   :  { %7 = vsyncpa [#allocation3], 0  ;;  %s147_s0 = inlined_call_operand.vmem [shape: f32[8,2], index: 0, kind: input, shape index: {}]   ;;  %s148_s1 = inlined_call_operand.hbm [shape: f32[8,256], index: 1, kind: input, shape index: {}]   ;;  %s149_s2 = inlined_call_operand.hbm [shape: f32[8,256], index: 2, kind: output, shape index: {}]  }
   0x1   :  { %8 = vsyncpa [#allocation4], 0  ;;  %s16_s11 = sshll.u32 %s148_s1, 4  ;;  %s119_s12 = smov [#allocation2]   ;;  %s17_s11 = int_to_ptr.hbm [resolvable:$true] %s16_s11 }
   0x2   :  { %s18_s13 = sshll.u32 %s119_s12, 4  ;;  %s19_s13 = int_to_ptr.vmem [resolvable:$true] %s18_s13 }
   0x3   :  { %21 = dma.hbm_to_vmem [thread:$0]  %s17_s11, 256, %s19_s13, [#allocation3]  }
   0x4   :  { %115 = dma.done.wait [#allocation3], 256  }
   0x5   :  { %116 = vsyncadd [#allocation3], 4294967040  ;;  %v120_v0 = vmov 0   ;;  %v26_v1 = vld [vmem:[%s147_s0] sm:$0xff]  ;;  %v121_v2 = vmov 1   ;;  %v28_v5 = vld [vmem:[#allocation2 + $0x8] sm:$0xff] }
   0x6   :  { %65 = vset.pattern.permute.xlu0 %v120_v0  ;;  %v27_v4 = vld [vmem:[#allocation2] sm:$0xff]  ;;  %s122_s1 = smov [#allocation5]   ;;  %s51_s19 = sshll.u32 %s149_s2, 4  ;;  %s52_s19 = int_to_ptr.hbm [resolvable:$true] %s51_s19 }
   0x7   :  { %31 = vperm.xlu0 %65, %v26_v1   ;;  %s49_s16 = sshll.u32 %s122_s1, 4  ;;  %s50_s16 = int_to_ptr.vmem [resolvable:$true] %s49_s16 }
   0xf   :  { %66 = vset.pattern.permute.xlu0 %v121_v2 }
  0x10   :  { %37 = vperm.xlu0 %66, %v26_v1  }
  0x79   :  { %v32_v3 = vpop.permute.xlu0 %31 }
  0x7a   :  { %v34_v6 = vmul.f32 %v32_v3, %v27_v4  ;;  %v35_v7 = vmul.f32 %v32_v3, %v28_v5 }
  0x82   :  { %v38_v8 = vpop.permute.xlu0 %37 }
  0x83   :  { %v40_v9 = vadd.f32 %v38_v8, %v34_v6  ;;  %v41_v10 = vadd.f32 %v38_v8, %v35_v7 }
  0x85   :  { %42 = vst [vmem:[#allocation5] sm:$0xff] %v40_v9 }
  0x86   :  { %43 = vst [vmem:[#allocation5 + $0x8] sm:$0xff] %v41_v10 }
  0x87   :  { %54 = dma.vmem_to_hbm [thread:$0]  %s50_s16, 256, %s52_s19, [#allocation4]  }
  0x88   :  { %117 = dma.done.wait [#allocation4], 256  }
  0x89   :  { %118 = vsyncadd [#allocation4], 4294967040 }
  0x8a   :  { %59 = vsyncpa [#allocation3], 1 }
  0x8b   :  { %60 = vsyncpa [#allocation4], 1 }

</bundles_post_ra>
